<compile_context>
chip_gen: v7x
topology: tpu7x:2x2x1
jax: 0.10.0
libtpu: 0.0.40
codegen_flags: <defaults>
</compile_context>

<pallas_src>
import functools

import jax
import jax.numpy as jnp
from jax.experimental import pallas as pl
from jax.experimental.pallas import tpu as pltpu

LANE = 128


def _round_up(x, m):
    return (x + m - 1) // m * m


def _base_model_kernel(x_ref, wslab_ref, pack_ref, b2_ref, out_ref,
                       *, B, S, Dp, Hp, Op, S_seg):
    # --- static ref slices of the packed operand slabs (no full-slab load) ---
    w1 = wslab_ref[0:Dp, :Hp]                              # (Dp, Hp) bf16
    w3 = wslab_ref[Dp:Dp + S, :Hp]                         # (S,  Hp) bf16
    w4 = wslab_ref[Dp + S_seg:Dp + S_seg + Hp, :Op]        # (Hp, Op) bf16

    b1 = pack_ref[0:1, :Hp]                                # (1, Hp) f32
    b3 = pack_ref[1:2, :Hp]                                # (1, Hp) f32
    b4 = pack_ref[2:3, :Op]                                # (1, Op) f32
    w2 = pack_ref[3:4, :Hp]                                # (1, Hp) f32

    # --- linear1 + relu1: one bf16 MXU pass over all B*S rows ---------------
    h1 = jnp.dot(x_ref[...], w1, preferred_element_type=jnp.float32)
    h1 = jnp.maximum(h1 + b1, 0.0)                         # (B*S, Hp) f32

    # --- linear2 (Hp -> 1) + squeeze(-1); b2 read from SMEM scalar path -----
    # f32 (B*S, Hp) -> (B, S, Hp) is tile-layout preserving (no data movement).
    logits = jnp.sum(h1.reshape(B, S, Hp) * w2[None], axis=-1) + b2_ref[0, 0]  # (B, S)

    # --- softmax over the (un-padded) S axis; reciprocal on the EUP ---------
    m = jnp.max(logits, axis=-1, keepdims=True)
    e = jnp.exp(logits - m)
    inv = pl.reciprocal(jnp.sum(e, axis=-1, keepdims=True), approx=True)
    score = e * inv                                        # (B, S) f32

    # --- linear3 + relu2 -----------------------------------------------------
    h2 = jnp.dot(score.astype(jnp.bfloat16), w3, preferred_element_type=jnp.float32)
    h2 = jnp.maximum(h2 + b3, 0.0)                         # (B, Hp) f32

    # --- linear4: lane-dense padded store (padded lanes are exact zeros) ----
    out = jnp.dot(h2.astype(jnp.bfloat16), w4, preferred_element_type=jnp.float32)
    out_ref[...] = out + b4                                # (B, Op) f32


def base_model_forward(x, params):
    """x: (B, S=output_dim, D=input_dim) float32 -> (B, output_dim + 1) float32."""
    B, S, D = x.shape
    meta = params["meta"]
    Dp, Hp, Op, S_seg, od1 = meta["Dp"], meta["Hp"], meta["Op"], meta["S_seg"], meta["od1"]

    # Wrapper-side layout plumbing: zero-pad the contraction dim to the lane
    # width, cast the matmul operand to bf16, and merge the leading dims so the
    # kernel never has to repack a half-tile bf16 reshape.
    x_p = jnp.pad(x, ((0, 0), (0, 0), (0, Dp - D))).astype(jnp.bfloat16)
    x_p = x_p.reshape(B * S, Dp)

    kernel = functools.partial(
        _base_model_kernel, B=B, S=S, Dp=Dp, Hp=Hp, Op=Op, S_seg=S_seg)

    vmem = pl.BlockSpec(memory_space=pltpu.MemorySpace.VMEM)
    smem = pl.BlockSpec(memory_space=pltpu.MemorySpace.SMEM)

    out_padded = pl.pallas_call(
        kernel,
        out_shape=jax.ShapeDtypeStruct((B, Op), jnp.float32),
        in_specs=[vmem, vmem, vmem, smem],
        out_specs=vmem,
    )(x_p, params["wslab"], params["pack"], params["b2"])

    return out_padded[:, :od1]


def init_params(key, input_dim, hidden_dim, output_dim):
    """Deterministic init matching nn.Linear shapes (weights stored transposed,
    i.e. (in_features, out_features)), plus the packed/padded kernel slabs."""
    ks = jax.random.split(key, 8)

    def u(k, shape, fan_in):
        bound = 1.0 / (fan_in ** 0.5)
        return jax.random.uniform(k, shape, jnp.float32, -bound, bound)

    H, od1, S = hidden_dim, output_dim + 1, output_dim
    p = {
        # linear1: input_dim -> hidden_dim
        "w1": u(ks[0], (input_dim, H), input_dim),
        "b1": u(ks[1], (1, H), input_dim),
        # linear2: hidden_dim -> 1  (stored as a (1, H) row, bias as (1, 1))
        "w2": u(ks[2], (1, H), H),
        "b2": u(ks[3], (1, 1), H),
        # linear3: output_dim -> hidden_dim
        "w3": u(ks[4], (S, H), S),
        "b3": u(ks[5], (1, H), S),
        # linear4: hidden_dim -> output_dim + 1
        "w4": u(ks[6], (H, od1), H),
        "b4": u(ks[7], (1, od1), H),
    }

    Dp = _round_up(input_dim, LANE)
    Hp = _round_up(H, LANE)
    Op = _round_up(od1, LANE)
    Wl = max(Hp, Op)                  # common lane width of both slabs
    S_seg = _round_up(S, 16)          # bf16 packs 16 sublanes/vreg -> aligned segments

    def pad2(a, rows, cols):
        return jnp.pad(a, ((0, rows - a.shape[0]), (0, cols - a.shape[1])))

    # One bf16 matmul-weight slab: sublane-stacked [w1 | w3 | w4], Wl lanes.
    p["wslab"] = jnp.concatenate(
        [pad2(p["w1"], Dp, Wl), pad2(p["w3"], S_seg, Wl), pad2(p["w4"], Hp, Wl)],
        axis=0,
    ).astype(jnp.bfloat16)            # (Dp + S_seg + Hp, Wl)

    # One f32 row slab for the small vector operands: rows [b1; b3; b4; w2].
    p["pack"] = jnp.concatenate(
        [pad2(p["b1"], 1, Wl), pad2(p["b3"], 1, Wl),
         pad2(p["b4"], 1, Wl), pad2(p["w2"], 1, Wl)],
        axis=0,
    )                                 # (4, Wl) f32

    p["meta"] = dict(Dp=Dp, Hp=Hp, Op=Op, S_seg=S_seg, od1=od1)
    return p


def reference_forward(x, p):
    """Pure-JAX f32 reference of the PyTorch forward, for sanity checking."""
    h1 = jnp.maximum(jnp.einsum("bsd,dh->bsh", x, p["w1"]) + p["b1"][None], 0.0)
    logits = jnp.sum(h1 * p["w2"][None], axis=-1) + p["b2"][0, 0]
    score = jax.nn.softmax(logits, axis=-1)
    h2 = jnp.maximum(score @ p["w3"] + p["b3"], 0.0)
    return h2 @ p["w4"] + p["b4"]


if __name__ == "__main__":
    # Small shapes consistent with the module:
    #   input_dim=16, hidden_dim=32, output_dim=8  ->  x: (2, 8, 16), out: (2, 9)
    batch, input_dim, hidden_dim, output_dim = 2, 16, 32, 8

    key = jax.random.PRNGKey(0)
    kx, kp = jax.random.split(key)
    x = jax.random.normal(kx, (batch, output_dim, input_dim), jnp.float32)
    params = init_params(kp, input_dim, hidden_dim, output_dim)

    out = base_model_forward(x, params)
    out = jax.block_until_ready(out)

    ref = reference_forward(x, params)
    assert out.shape == (batch, output_dim + 1)
    # bf16 matmul operands + approx (EUP) reciprocal => loosened tolerance.
    assert jnp.allclose(out, ref, atol=3e-2, rtol=3e-2)

    print("KERNEL_OK")
</pallas_src>

<mosaic_0001>
module attributes {stable_mosaic.version = 11 : i64} {
  func.func @_base_model_kernel(%arg0: memref<16x128xbf16, #tpu.memory_space<vmem>>, %arg1: memref<272x128xbf16, #tpu.memory_space<vmem>>, %arg2: memref<4x128xf32, #tpu.memory_space<vmem>>, %arg3: memref<1x1xf32, #tpu.memory_space<smem>>, %arg4: memref<2x128xf32, #tpu.memory_space<vmem>>) attributes {dimension_semantics = [], scalar_prefetch = 0 : i64, scratch_operands = 0 : i64, tpu.core_type = #tpu.core_type<tc>} {
    %c0 = arith.constant 0 : index
    %c0_0 = arith.constant 0 : index
    %0 = vector.load %arg1[%c0, %c0_0] : memref<272x128xbf16, #tpu.memory_space<vmem>>, vector<128x128xbf16>
    %c128 = arith.constant 128 : index
    %c0_1 = arith.constant 0 : index
    %1 = vector.load %arg1[%c128, %c0_1] : memref<272x128xbf16, #tpu.memory_space<vmem>>, vector<8x128xbf16>
    %c144 = arith.constant 144 : index
    %c0_2 = arith.constant 0 : index
    %2 = vector.load %arg1[%c144, %c0_2] : memref<272x128xbf16, #tpu.memory_space<vmem>>, vector<128x128xbf16>
    %c0_3 = arith.constant 0 : index
    %c0_4 = arith.constant 0 : index
    %3 = vector.load %arg2[%c0_3, %c0_4] : memref<4x128xf32, #tpu.memory_space<vmem>>, vector<1x128xf32>
    %c1 = arith.constant 1 : index
    %c0_5 = arith.constant 0 : index
    %4 = vector.load %arg2[%c1, %c0_5] : memref<4x128xf32, #tpu.memory_space<vmem>>, vector<1x128xf32>
    %c2 = arith.constant 2 : index
    %c0_6 = arith.constant 0 : index
    %5 = vector.load %arg2[%c2, %c0_6] : memref<4x128xf32, #tpu.memory_space<vmem>>, vector<1x128xf32>
    %c3 = arith.constant 3 : index
    %c0_7 = arith.constant 0 : index
    %6 = vector.load %arg2[%c3, %c0_7] : memref<4x128xf32, #tpu.memory_space<vmem>>, vector<1x128xf32>
    %c0_8 = arith.constant 0 : index
    %c0_9 = arith.constant 0 : index
    %7 = vector.load %arg0[%c0_8, %c0_9] : memref<16x128xbf16, #tpu.memory_space<vmem>>, vector<16x128xbf16>
    %cst = arith.constant dense<0.000000e+00> : vector<16x128xf32>
    %8 = tpu.matmul %7, %0, %cst {dimension_numbers = #tpu.dot_dimension_numbers<[1], [0], [0], [1], [0, 0, 1, 1], [], []>} : vector<16x128xbf16>, vector<128x128xbf16>, vector<16x128xf32> -> vector<16x128xf32>
    %9 = vector.broadcast %3 : vector<1x128xf32> to vector<16x128xf32>
    %10 = arith.addf %8, %9 : vector<16x128xf32>
    %cst_10 = arith.constant 0.000000e+00 : f32
    %11 = vector.broadcast %cst_10 : f32 to vector<16x128xf32>
    %12 = arith.maximumf %10, %11 : vector<16x128xf32>
    %13 = vector.shape_cast %12 : vector<16x128xf32> to vector<2x8x128xf32>
    %14 = vector.shape_cast %6 : vector<1x128xf32> to vector<1x1x128xf32>
    %15 = vector.broadcast %14 : vector<1x1x128xf32> to vector<2x8x128xf32>
    %16 = arith.mulf %13, %15 : vector<2x8x128xf32>
    %cst_11 = arith.constant dense<0.000000e+00> : vector<2x8xf32>
    %17 = vector.multi_reduction <add>, %16, %cst_11 [2] : vector<2x8x128xf32> to vector<2x8xf32>
    %c0_12 = arith.constant 0 : index
    %c0_13 = arith.constant 0 : index
    %18 = memref.load %arg3[%c0_12, %c0_13] : memref<1x1xf32, #tpu.memory_space<smem>>
    %19 = vector.broadcast %18 : f32 to vector<2x8xf32>
    %20 = arith.addf %17, %19 : vector<2x8xf32>
    %cst_14 = arith.constant dense<0xFF800000> : vector<2xf32>
    %21 = vector.multi_reduction <maximumf>, %20, %cst_14 [1] : vector<2x8xf32> to vector<2xf32>
    %22 = vector.shape_cast %21 : vector<2xf32> to vector<2x1xf32>
    %23 = vector.broadcast %22 : vector<2x1xf32> to vector<2x8xf32>
    %24 = arith.subf %20, %23 : vector<2x8xf32>
    %25 = math.exp %24 : vector<2x8xf32>
    %cst_15 = arith.constant dense<0.000000e+00> : vector<2xf32>
    %26 = vector.multi_reduction <add>, %25, %cst_15 [1] : vector<2x8xf32> to vector<2xf32>
    %27 = vector.shape_cast %26 : vector<2xf32> to vector<2x1xf32>
    %28 = tpu.reciprocal %27 {approx = true} : vector<2x1xf32> -> vector<2x1xf32>
    %29 = vector.broadcast %28 : vector<2x1xf32> to vector<2x8xf32>
    %30 = arith.mulf %25, %29 : vector<2x8xf32>
    %31 = arith.truncf %30 : vector<2x8xf32> to vector<2x8xbf16>
    %cst_16 = arith.constant dense<0.000000e+00> : vector<2x128xf32>
    %32 = tpu.matmul %31, %1, %cst_16 {dimension_numbers = #tpu.dot_dimension_numbers<[1], [0], [0], [1], [0, 0, 1, 1], [], []>} : vector<2x8xbf16>, vector<8x128xbf16>, vector<2x128xf32> -> vector<2x128xf32>
    %33 = vector.broadcast %4 : vector<1x128xf32> to vector<2x128xf32>
    %34 = arith.addf %32, %33 : vector<2x128xf32>
    %cst_17 = arith.constant 0.000000e+00 : f32
    %35 = vector.broadcast %cst_17 : f32 to vector<2x128xf32>
    %36 = arith.maximumf %34, %35 : vector<2x128xf32>
    %37 = arith.truncf %36 : vector<2x128xf32> to vector<2x128xbf16>
    %cst_18 = arith.constant dense<0.000000e+00> : vector<2x128xf32>
    %38 = tpu.matmul %37, %2, %cst_18 {dimension_numbers = #tpu.dot_dimension_numbers<[1], [0], [0], [1], [0, 0, 1, 1], [], []>} : vector<2x128xbf16>, vector<128x128xbf16>, vector<2x128xf32> -> vector<2x128xf32>
    %39 = vector.broadcast %5 : vector<1x128xf32> to vector<2x128xf32>
    %40 = arith.addf %38, %39 : vector<2x128xf32>
    %c0_19 = arith.constant 0 : index
    %c0_20 = arith.constant 0 : index
    %41 = vector.load %arg4[%c0_19, %c0_20] : memref<2x128xf32, #tpu.memory_space<vmem>>, vector<2x128xf32>
    tpu.vector_store %arg4[%c0_19, %c0_20], %40 {strides = array<i32>} : memref<2x128xf32, #tpu.memory_space<vmem>>, vector<2x128xf32>,
    return
  }
}

</mosaic_0001>

<bundles_post_ra>
// kernel: tpu_custom_call.1
= control target key start
LH: loop header
LB: loop body
LE: loop exit
PB: predicated region body
PF: predicated region fallthrough
CT: control target
= control target key end

     0   :  { %10 = vsyncpa [#allocation4], 0  ;;  %s763_s0 = inlined_call_operand.hbm [shape: bf16[16,128], index: 0, kind: input, shape index: {}]   ;;  %s764_s1 = inlined_call_operand.hbm [shape: bf16[272,128], index: 1, kind: input, shape index: {}]   ;;  %s765_s2 = inlined_call_operand.vmem [shape: f32[4,128], index: 2, kind: input, shape index: {}]   ;;  %s766_s3 = inlined_call_operand.<no memory space> [shape: f32[1,1], index: 3, kind: input, shape index: {}]   ;;  %s767_s4 = inlined_call_operand.hbm [shape: f32[2,128], index: 4, kind: output, shape index: {}]  }
   0x1   :  { %11 = vsyncpa [#allocation7], 0 }
   0x2   :  { %12 = vsyncpa [#allocation5], 0  ;;  %s651_s15 = smov [#allocation3]   ;;  %s579_s19 = scalar_lea.hbm %s763_s0, 128 }
   0x3   :  { %s18_s16 = sshll.u32 %s651_s15, 4  ;;  %p580_p0 = scmp.ne.s32.totalorder %s763_s0, %s579_s19  ;;  %s19_s16 = int_to_ptr.vmem [resolvable:$true] %s18_s16 }
   0x4   :  { %p583_p1 = scmp.lt.u32.totalorder %s579_s19, %s763_s0 }
   0x6   :  { %p585_p2 = pnand %p583_p1, %p580_p0 }
   0x8   :  { %588 = shalt.err (!%p585_p2)
}
   0x9   :  { %s589_s24 = scalar_lea.vmem %s19_s16, 128  ;;  %p594_p4 = scmp.lt.s32.totalorder %s19_s16, %s19_s16 }
   0xa   :  { %p590_p3 = scmp.ne.s32.totalorder %s19_s16, %s589_s24  ;;  %p595_p5 = scmp.lt.s32.totalorder %s589_s24, %s589_s24 }
   0xc   :  { %p596_p6 = por %p595_p5, %p594_p4 }
   0xe   :  { %p597_p7 = pnand %p596_p6, %p590_p3 }
  0x10   :  { %600 = shalt.err (!%p597_p7)
}
  0x11   :  { %s652_s25 = smov 64   ;;  %s653_s26 = smov 4  }
  0x12   :  { %24 = dma.hbm_to_vmem [thread:$0]  %s763_s0, 128, %s19_s16, [#allocation4], %s652_s25, %s652_s25, %s653_s26  }
  0x13   :  { %s654_s29 = smov [#allocation6]   ;;  %s601_s7 = scalar_lea.hbm %s764_s1, 2176 }
  0x14   :  { %s30_s30 = sshll.u32 %s654_s29, 4  ;;  %p602_p8 = scmp.ne.s32.totalorder %s764_s1, %s601_s7  ;;  %s31_s30 = int_to_ptr.vmem [resolvable:$true] %s30_s30 }
  0x15   :  { %p605_p9 = scmp.lt.u32.totalorder %s601_s7, %s764_s1 }
  0x17   :  { %p607_p10 = pnand %p605_p9, %p602_p8 }
  0x19   :  { %610 = shalt.err (!%p607_p10)
}
  0x1a   :  { %s611_s12 = scalar_lea.vmem %s31_s30, 2176  ;;  %p616_p12 = scmp.lt.s32.totalorder %s31_s30, %s31_s30 }
  0x1b   :  { %p612_p11 = scmp.ne.s32.totalorder %s31_s30, %s611_s12  ;;  %p617_p13 = scmp.lt.s32.totalorder %s611_s12, %s611_s12 }
  0x1d   :  { %p618_p0 = por %p617_p13, %p616_p12 }
  0x1f   :  { %p619_p1 = pnand %p618_p0, %p612_p11 }
  0x21   :  { %622 = shalt.err (!%p619_p1)
}
  0x22   :  { %36 = dma.hbm_to_vmem [thread:$0]  %s764_s1, 2176, %s31_s30, [#allocation7], %s652_s25, %s652_s25, %s653_s26  }
  0x23   :  { %645 = dma.done.wait [#allocation4], 128  }
  0x24   :  { %646 = vsyncadd [#allocation4], 4294967168 }
  0x25   :  { %647 = dma.done.wait [#allocation7], 2176  }
  0x26   :  { %648 = vsyncadd [#allocation7], 4294965120  ;;  %v655_v0 = vmov 0.0   ;;  %vm656_vm0 = vmmov 0   ;;  %v556_v1 = vld [vmem:[#allocation6] sm:$0xff]   ;;  %v557_v2 = vld [vmem:[#allocation6 + $0x8] sm:$0xff]   ;;  %v204_v22 = vlaneseq  ;;  %v199_v25 = vstv %s766_s3 }
  0x27   :  { %500 = vmatprep.subr.bf16.mxu0 %v655_v0  ;;  %516 = vmatprep.mubr.msk.bf16.mxu0 %vm656_vm0, %v655_v0  ;;  %v558_v3 = vld [vmem:[#allocation6 + $0x10] sm:$0xff]   ;;  %v559_v4 = vld [vmem:[#allocation6 + $0x18] sm:$0xff]   ;;  %v560_v5 = vld [vmem:[#allocation6 + $0x20] sm:$0xff]   ;;  %vm214_vm1 = vcmask 1041409   ;;  %vm217_vm2 = vcmask 58368   ;;  %v657_v35 = vmov 0  }
  0x28   :  { %520 = vmatprep.subr.bf16.mxu1 %v655_v0  ;;  %522 = vmatprep.mubr.msk.bf16.mxu1 %vm656_vm0, %v655_v0  ;;  %v561_v6 = vld [vmem:[#allocation6 + $0x28] sm:$0xff]   ;;  %v562_v7 = vld [vmem:[#allocation6 + $0x30] sm:$0xff]   ;;  %v563_v8 = vld [vmem:[#allocation6 + $0x38] sm:$0xff]   ;;  %v205_v23 = vand.u32 127, %v204_v22  ;;  %v207_v24 = vshrl.u32 %v204_v22, 7  ;;  %vm303_vm3 = vcmask 1043456  }
  0x29   :  { %501 = vmatpush3.bf16.msra.mxu0 %v556_v1  ;;  %v564_v9 = vld [vmem:[#allocation3] sm:$0xff]   ;;  %555 = vset.pattern.permute.xlu0 %v657_v35  ;;  %v64_v63 = vld [vmem:[#allocation6 + $0x40] sm:$0xf]  ;;  %vm299_vm4 = vcmask 64512   ;;  %s658_s22 = smov [#allocation8]  }
  0x2a   :  { %502 = vmatprep.subr.bf16.mxu0 %v655_v0  ;;  %v458_v10 = vld [vmem:[%s765_s2] ss:$0 sm:$0xff]  ;;  %v468_v15 = vld [vmem:[%s765_s2 + $0x3] ss:$0 sm:$0xff]  ;;  %v208_v27 = vsub.s32 %v205_v23, %v207_v24  ;;  %554 = vset.pattern.permute.xlu1 %v657_v35  ;;  %v224_v36 = vsub.s32 0, %v207_v24  ;;  %v228_v37 = vsub.s32 1, %v207_v24 }
  0x2b   :  { %v305_v1 = vsel %vm303_vm3, %v64_v63, 0  ;;  %v471_v24 = vld [vmem:[%s765_s2 + $0x2] ss:$0 sm:$0xff]  ;;  %s448_s23 = sshll.u32 %s658_s22, 4  ;;  %s449_s23 = int_to_ptr.vmem [resolvable:$true] %s448_s23 }
  0x2c   :  { %521 = vmatpush3.bf16.msra.mxu1 %v305_v1  ;;  %s623_s24 = scalar_lea.vmem %s449_s23, 32  ;;  %p628_p3 = scmp.lt.s32.totalorder %s449_s23, %s449_s23 }
  0x2d   :  { %503 = vmatpush3.bf16.msra.mxu0 %v557_v2  ;;  %526 = vmatprep.subr.bf16.mxu1 %v655_v0  ;;  %p624_p2 = scmp.ne.s32.totalorder %s449_s23, %s623_s24  ;;  %p629_p4 = scmp.lt.s32.totalorder %s623_s24, %s623_s24 }
  0x2e   :  { %504 = vmatprep.subr.bf16.mxu0 %v655_v0 }
  0x2f   :  { %p630_p5 = por %p629_p4, %p628_p3 }
  0x31   :  { %505 = vmatpush3.bf16.msra.mxu0 %v558_v3  ;;  %p631_p6 = pnand %p630_p5, %p624_p2 }
  0x32   :  { %506 = vmatprep.subr.bf16.mxu0 %v655_v0 }
  0x35   :  { %507 = vmatpush3.bf16.msra.mxu0 %v559_v4 }
  0x36   :  { %508 = vmatprep.subr.bf16.mxu0 %v655_v0 }
  0x39   :  { %509 = vmatpush3.bf16.msra.mxu0 %v560_v5 }
  0x3a   :  { %510 = vmatprep.subr.bf16.mxu0 %v655_v0 }
  0x3d   :  { %511 = vmatpush3.bf16.msra.mxu0 %v561_v6 }
  0x3e   :  { %512 = vmatprep.subr.bf16.mxu0 %v655_v0 }
  0x41   :  { %513 = vmatpush3.bf16.msra.mxu0 %v562_v7  ;;  %v565_v7 = vld [vmem:[#allocation6 + $0x48] sm:$0xff]  }
  0x42   :  { %514 = vmatprep.subr.bf16.mxu0 %v655_v0 }
  0x45   :  { %515 = vmatpush3.bf16.msra.mxu0 %v563_v8 }
  0x48   :  { %517 = vmatmul.mubr.bf16.vlgmr.msra.gmra.mrb[0].mxu0 %v564_v9  ;;  %v566_v9 = vld [vmem:[#allocation6 + $0x50] sm:$0xff]  }
 0x11b   :  { %v179_v11 = vpop.f32.mrb[0].mxu0 }
 0x11c   :  { %v180_v12 = vadd.f32 %v458_v10, %v179_v11  ;;  %v518_v13 = vpop.f32.mrb[1].mxu0  ;;  %v568_v11 = vld [vmem:[#allocation6 + $0x60] sm:$0xff]  }
 0x11d   :  { %v182_v14 = vpop.f32.mrb[2].mxu0  ;;  %v570_v13 = vld [vmem:[#allocation6 + $0x70] sm:$0xff]  }
 0x11e   :  { %v186_v16 = vmax.f32 %v180_v12, 0.0  ;;  %v183_v17 = vadd.f32 %v458_v10, %v182_v14  ;;  %v519_v18 = vpop.f32.mrb[3].mxu0  ;;  %v567_v10 = vld [vmem:[#allocation6 + $0x58] sm:$0xff]   ;;  %v569_v12 = vld [vmem:[#allocation6 + $0x68] sm:$0xff]  }
 0x11f   :  { %v571_v14 = vld [vmem:[#allocation6 + $0x78] sm:$0xff]  }
 0x120   :  { %v187_v19 = vmax.f32 %v183_v17, 0.0  ;;  %v192_v20 = vmul.f32 %v468_v15, %v186_v16  ;;  %v469_v16 = vld [vmem:[%s765_s2 + $0x1] ss:$0 sm:$0xff] }
 0x122   :  { %194 = vadd.xlane.f32.xlu0 %v192_v20  ;;  %v193_v21 = vmul.f32 %v468_v15, %v187_v19  ;;  %v572_v15 = vld [vmem:[#allocation6 + $0x80] sm:$0xff]  }
 0x126   :  { %196 = vadd.xlane.f32.xlu0 %v193_v21 }
 0x1af   :  { %v195_v26 = vpop.xlane.xlu0 %194 }
 0x1b0   :  { %v200_v28 = vadd.f32 %v199_v25, %v195_v26 }
 0x1b2   :  { %v209_v31 = vrot.slane %v200_v28, %v208_v27 }
 0x1b3   :  { %v197_v29 = vpop.xlane.xlu0 %196 }
 0x1b4   :  { %v201_v30 = vadd.f32 %v199_v25, %v197_v29 }
 0x1b6   :  { %v213_v32 = vrot.slane %v201_v30, %v208_v27 }
 0x1b8   :  { %v215_v33 = vsel %vm214_vm1, %v213_v32, %v209_v31 }
 0x1b9   :  { %v218_v34 = vsel %vm217_vm2, %v215_v33, -inf }
 0x1ba   :  { %219 = vmax.xlane.f32.xlu1 %v218_v34 }
 0x247   :  { %v220_v38 = vpop.xlane.xlu1 %219 }
 0x248   :  { %v225_v39 = vrot.slane %v220_v38, %v224_v36  ;;  %v229_v40 = vrot.slane %v220_v38, %v228_v37 }
 0x24a   :  { %v232_v41 = vsub.f32 %v200_v28, %v225_v39  ;;  %v233_v42 = vsub.f32 %v201_v30, %v229_v40 }
 0x24c   :  { %v234_v43 = vmul.f32 1.442695, %v232_v41  ;;  %v236_v44 = vmul.f32 1.442695, %v233_v42 }
 0x24e   :  { %573 = vpow2.f32 %v234_v43 }
 0x24f   :  { %575 = vpow2.f32 %v236_v44 }
 0x258   :  { %v574_v45 = vpop.eup %573 }
 0x259   :  { %v576_v46 = vpop.eup %575  ;;  %241 = vperm.xlu1 %554, %v574_v45  }
 0x25a   :  { %244 = vperm.xlu0 %555, %v576_v46  }
 0x2d8   :  { %v242_v47 = vpop.permute.xlu1 %241 }
 0x2d9   :  { %v245_v48 = vpop.permute.xlu0 %244  ;;  %v249_v49 = vrot.slane %v242_v47, %v208_v27 }
 0x2da   :  { %v253_v50 = vrot.slane %v245_v48, %v208_v27 }
 0x2dc   :  { %v254_v51 = vsel %vm214_vm1, %v253_v50, %v249_v49 }
 0x2dd   :  { %v256_v52 = vsel %vm217_vm2, %v254_v51, 0.0 }
 0x2de   :  { %257 = vadd.xlane.f32.xlu1 %v256_v52 }
 0x36b   :  { %v258_v53 = vpop.xlane.xlu1 %257 }
 0x36c   :  { %577 = vrcp.f32 %v258_v53 }
 0x376   :  { %v578_v54 = vpop.eup %577 }
 0x377   :  { %v264_v55 = vrot.slane %v578_v54, %v224_v36  ;;  %v268_v56 = vrot.slane %v578_v54, %v228_v37 }
 0x379   :  { %v271_v57 = vmul.f32 %v574_v45, %v264_v55  ;;  %v272_v58 = vmul.f32 %v576_v46, %v268_v56 }
 0x37b   :  { %v273_v59 = vpack.c.bf16 %v271_v57, %v271_v57  ;;  %v274_v61 = vpack.c.bf16 %v272_v58, %v272_v58 }
 0x37d   :  { %v281_v60 = vunpack.c.l.b16 %v273_v59  ;;  %v282_v62 = vunpack.c.l.b16 %v274_v61 }
 0x37f   :  { %284 = vperm.xlu0 %555, %v281_v60  }
 0x383   :  { %287 = vperm.xlu0 %555, %v282_v62  }
 0x3fe   :  { %v285_v2 = vpop.permute.xlu0 %284 }
 0x3ff   :  { %v292_v4 = vrot.slane %v285_v2, %v208_v27 }
 0x402   :  { %v288_v3 = vpop.permute.xlu0 %287 }
 0x403   :  { %v296_v5 = vrot.slane %v288_v3, %v208_v27 }
 0x405   :  { %v297_v6 = vsel %vm214_vm1, %v296_v5, %v292_v4 }
 0x406   :  { %v298_v8 = vpack.c.b16 %v297_v6, %v297_v6 }
 0x408   :  { %523 = vmatmul.mubr.msk.bf16.vlgmr.msra.gmra.mrb[0].mxu1 %vm299_vm4, %v298_v8 }
 0x409   :  { %527 = vmatpush3.bf16.msra.mxu1 %v565_v7  ;;  %542 = vmatprep.mubr.msk.bf16.mxu1 %vm656_vm0, %v655_v0 }
 0x40a   :  { %528 = vmatprep.subr.bf16.mxu1 %v655_v0 }
 0x40d   :  { %529 = vmatpush3.bf16.msra.mxu1 %v566_v9 }
 0x40e   :  { %530 = vmatprep.subr.bf16.mxu1 %v655_v0 }
 0x411   :  { %531 = vmatpush3.bf16.msra.mxu1 %v567_v10 }
 0x412   :  { %532 = vmatprep.subr.bf16.mxu1 %v655_v0 }
 0x415   :  { %533 = vmatpush3.bf16.msra.mxu1 %v568_v11 }
 0x416   :  { %534 = vmatprep.subr.bf16.mxu1 %v655_v0 }
 0x419   :  { %535 = vmatpush3.bf16.msra.mxu1 %v569_v12 }
 0x41a   :  { %536 = vmatprep.subr.bf16.mxu1 %v655_v0 }
 0x41d   :  { %537 = vmatpush3.bf16.msra.mxu1 %v570_v13 }
 0x41e   :  { %538 = vmatprep.subr.bf16.mxu1 %v655_v0 }
 0x421   :  { %539 = vmatpush3.bf16.msra.mxu1 %v571_v14 }
 0x422   :  { %540 = vmatprep.subr.bf16.mxu1 %v655_v0 }
 0x425   :  { %541 = vmatpush3.bf16.msra.mxu1 %v572_v15 }
 0x4db   :  { %v341_v17 = vpop.f32.mrb[0].mxu1 }
 0x4dc   :  { %v342_v18 = vadd.f32 %v469_v16, %v341_v17  ;;  %v524_v19 = vpop.f32.mrb[1].mxu1 }
 0x4dd   :  { %v344_v20 = vpop.f32.mrb[2].mxu1 }
 0x4de   :  { %v347_v21 = vmax.f32 %v342_v18, 0.0  ;;  %v525_v22 = vpop.f32.mrb[3].mxu1 }
 0x4e0   :  { %v348_v23 = vpack.c.bf16 %v347_v21, %v347_v21 }
 0x4e2   :  { %543 = vmatmul.mubr.bf16.vlgmr.msra.gmra.mrb[4].mxu1 %v348_v23 }
 0x5b5   :  { %v435_v0 = vpop.f32.mrb[4].mxu1 }
 0x5b6   :  { %v436_v25 = vadd.f32 %v471_v24, %v435_v0  ;;  %v544_v26 = vpop.f32.mrb[5].mxu1 }
 0x5b7   :  { %v438_v27 = vpop.f32.mrb[6].mxu1 }
 0x5b8   :  { %441 = vst [vmem:[#allocation8] sm:$0x3] %v436_v25  ;;  %v545_v28 = vpop.f32.mrb[7].mxu1 }
 0x5b9   :  { %634 = shalt.err (!%p631_p6)
}
 0x5ba   :  { %s635_s2 = scalar_lea.hbm %s767_s4, 32 }
 0x5bb   :  { %p636_p7 = scmp.ne.s32.totalorder %s767_s4, %s635_s2  ;;  %p639_p8 = scmp.lt.u32.totalorder %s635_s2, %s767_s4 }
 0x5bd   :  { %p641_p9 = pnand %p639_p8, %p636_p7 }
 0x5bf   :  { %644 = shalt.err (!%p641_p9)
}
 0x5c0   :  { %451 = dma.vmem_to_hbm [thread:$0]  %s449_s23, 32, %s767_s4, [#allocation5]  }
 0x5c1   :  { %649 = dma.done.wait [#allocation5], 32  }
 0x5c2   :  { %650 = vsyncadd [#allocation5], 4294967264 }
 0x5c3   :  { %455 = vsyncpa [#allocation4], 1 }
 0x5c4   :  { %456 = vsyncpa [#allocation7], 1 }
 0x5c5   :  { %457 = vsyncpa [#allocation5], 1 }

</bundles_post_ra>
